<compile_context>
chip_gen: v6e
topology: v6e:2x2x1
jax: 0.10.0
libtpu: 0.0.40
codegen_flags: <defaults>
</compile_context>

<pallas_src>
import functools

import jax
import jax.numpy as jnp
from jax import lax
from jax.experimental import pallas as pl
from jax.experimental.pallas import tpu as pltpu


# ------------------------------ small helpers -------------------------------

_LANE = 128


def _round_up(x, m):
    return -(-x // m) * m


def _pad2d(a, rows, cols):
    pr, pc = rows - a.shape[0], cols - a.shape[1]
    if pr or pc:
        a = jnp.pad(a, ((0, pr), (0, pc)))
    return a


def _pair(v):
    return (v, v) if isinstance(v, int) else tuple(v)


@functools.lru_cache(maxsize=None)
def _chip_defaults():
    """((tile_m, tile_n, tile_k), vmem_limit_bytes) per TPU generation.

    128-MiB-VMEM chips (v5e/v6e): 1024x1024 output tiles (high arithmetic
    intensity, v6e needs ~650 FLOP/byte).  64-MiB chips (v7x): 512-class tiles
    and a reduced VMEM limit so the compiler keeps internal-scratch headroom.
    """
    try:
        vmem = int(pltpu.get_tpu_info().vmem_capacity_bytes)
    except Exception:
        vmem = None
    if vmem is None:
        return (512, 512, 512), 48 * 1024 * 1024        # safe everywhere
    limit = min(vmem - 16 * 1024 * 1024, 96 * 1024 * 1024)
    if vmem >= 100 * 1024 * 1024:                        # v5e / v6e (128 MiB)
        return (1024, 1024, 512), limit
    return (512, 512, 512), limit                        # v7x (64 MiB physical)


def _tile_dims(M, N, K, itemsize, tiles):
    tile_m, tile_n, tile_k = tiles
    sub = {4: 8, 2: 16, 1: 32}.get(itemsize, 8)          # sublane packing
    tm = min(tile_m, _round_up(M, sub))
    tn = min(tile_n, _round_up(N, _LANE))                # lane-dense output
    tk = min(tile_k, _round_up(K, _LANE))
    return tm, tn, tk, _round_up(M, tm), _round_up(N, tn), _round_up(K, tk)


# ------------------ XA = x @ A^T  (tiny LoRA-down pre-GEMM) -----------------
# A^T stays fully VMEM-resident (single (Kp, rp) block, index_map (0,0));
# x is streamed; the per-k slice uses pl.ds + pl.multiple_of.

def _xa_kernel(tk, x_ref, at_ref, o_ref, acc_ref):
    k = pl.program_id(1)

    @pl.when(k == 0)
    def _():
        acc_ref[...] = jnp.zeros_like(acc_ref)

    ks = pl.multiple_of(k * tk, tk)
    acc_ref[...] += jnp.dot(x_ref[...], at_ref[pl.ds(ks, tk), :],
                            preferred_element_type=jnp.float32)

    @pl.when(k == pl.num_programs(1) - 1)
    def _():
        o_ref[...] = acc_ref[...].astype(o_ref.dtype)


def _xa_matmul(xp, at_pad, tm, tk, vmem_limit):
    """(Mp, Kp) @ (Kp, rp) -> (Mp, rp), output in xp.dtype (bf16-ready)."""
    Mp, Kp = xp.shape
    rp = at_pad.shape[1]
    return pl.pallas_call(
        functools.partial(_xa_kernel, tk),
        out_shape=jax.ShapeDtypeStruct((Mp, rp), xp.dtype),
        grid_spec=pltpu.PrefetchScalarGridSpec(
            num_scalar_prefetch=0,
            grid=(Mp // tm, Kp // tk),
            in_specs=[pl.BlockSpec((tm, tk), lambda i, k: (i, k)),
                      pl.BlockSpec((Kp, rp), lambda i, k: (0, 0))],   # resident A^T
            out_specs=pl.BlockSpec((tm, rp), lambda i, k: (i, 0)),
            scratch_shapes=[pltpu.VMEM((tm, rp), jnp.float32)],
        ),
        compiler_params=pltpu.CompilerParams(
            dimension_semantics=("parallel", "arbitrary"),
            vmem_limit_bytes=vmem_limit,
        ),
    )(xp, at_pad)


# ------------------- fused base GEMM + LoRA-up epilogue ---------------------
#   x: (Mp, Kp)   activations / im2col patches
#   W: (Np, Kp)   frozen weight, PyTorch (out, in) layout, NOT transposed
#   XA:(Mp, rp)   precomputed x @ A^T          B: (Np, rp)   lora_up
#   bias: (1, Np) optional, f32
# Grid = (M/tm, N/tn, K/tk); f32 accumulator in VMEM scratch; XA@B^T + bias
# are applied once per (i, j) tile in the k==last finalize.

def _lora_gemm_kernel(has_lora, has_bias, *refs):
    idx = 0
    x_ref = refs[idx]; idx += 1
    w_ref = refs[idx]; idx += 1
    if has_lora:
        xa_ref, b_ref = refs[idx], refs[idx + 1]; idx += 2
    if has_bias:
        bias_ref = refs[idx]; idx += 1
    o_ref, acc_ref = refs[idx], refs[idx + 1]

    k = pl.program_id(2)
    nt = (((1,), (1,)), ((), ()))            # contract last dims: u @ v^T

    @pl.when(k == 0)
    def _():
        acc_ref[...] = jnp.zeros_like(acc_ref)

    acc_ref[...] += lax.dot_general(x_ref[...], w_ref[...], nt,
                                    preferred_element_type=jnp.float32)

    @pl.when(k == pl.num_programs(2) - 1)
    def _():
        out = acc_ref[...]
        if has_lora:                          # one rank-sized pass, input dtype
            out = out + lax.dot_general(xa_ref[...], b_ref[...], nt,
                                        preferred_element_type=jnp.float32)
        if has_bias:
            out = out + bias_ref[...]
        o_ref[...] = out.astype(o_ref.dtype)


def lora_linear_2d(x2d, w, a=None, b=None, bias=None, *, n_out=None,
                   tiles=None, vmem_limit=None):
    """y = x2d @ w^T (+ (x2d @ a^T) @ b^T) (+ bias), output in x2d.dtype.

    `w` / `bias` may already be cast and zero-padded to tile multiples (pass
    `n_out` with the logical output width); re-padding already-padded operands
    is a no-op, so nothing extra happens per call for the frozen weight.
    """
    if tiles is None or vmem_limit is None:
        dt, dv = _chip_defaults()
        tiles = tiles or dt
        vmem_limit = vmem_limit or dv

    M, K = x2d.shape
    N = int(w.shape[0]) if n_out is None else int(n_out)
    out_dtype = x2d.dtype
    has_lora = (a is not None) and (b is not None)
    has_bias = bias is not None

    tm, tn, tk, Mp, Np, Kp = _tile_dims(M, N, K, x2d.dtype.itemsize, tiles)

    xp = _pad2d(x2d, Mp, Kp)
    wp = _pad2d(w.astype(out_dtype), Np, Kp)

    operands = [xp, wp]
    in_specs = [pl.BlockSpec((tm, tk), lambda i, j, k: (i, k)),
                pl.BlockSpec((tn, tk), lambda i, j, k: (j, k))]   # (out,in): no transpose

    rp = 0
    if has_lora:
        a2 = a.reshape(a.shape[0], -1).astype(out_dtype)          # (r, K)
        b2 = b.reshape(b.shape[0], -1).astype(out_dtype)          # (N, r)
        rp = _round_up(a2.shape[0], _LANE)
        at_pad = _pad2d(a2.T, Kp, rp)                             # tiny (Kp, rp)
        xa = _xa_matmul(xp, at_pad, tm, tk, vmem_limit)           # (Mp, rp), x dtype
        bp = _pad2d(b2, Np, rp)
        operands += [xa, bp]
        in_specs += [pl.BlockSpec((tm, rp), lambda i, j, k: (i, 0)),
                     pl.BlockSpec((tn, rp), lambda i, j, k: (j, 0))]

    if has_bias:
        bias2 = bias.astype(jnp.float32).reshape(1, -1)
        operands.append(_pad2d(bias2, 1, Np))
        in_specs.append(pl.BlockSpec((1, tn), lambda i, j, k: (0, j)))

    # Corrected cost estimate (LoRA flops + tile re-read factors included).
    it = jnp.dtype(out_dtype).itemsize
    gi, gj = Mp // tm, Np // tn
    flops = 2 * Mp * Kp * Np + (2 * Mp * rp * Np if has_lora else 0)
    bytes_accessed = (Mp * Kp * gj + Np * Kp * gi + Mp * Np) * it
    if has_lora:
        bytes_accessed += (Mp * rp + Np * rp * gi) * it
    if has_bias:
        bytes_accessed += Np * 4

    yp = pl.pallas_call(
        functools.partial(_lora_gemm_kernel, has_lora, has_bias),
        out_shape=jax.ShapeDtypeStruct((Mp, Np), out_dtype),
        grid_spec=pltpu.PrefetchScalarGridSpec(
            num_scalar_prefetch=0,
            grid=(Mp // tm, Np // tn, Kp // tk),
            in_specs=in_specs,
            out_specs=pl.BlockSpec((tm, tn), lambda i, j, k: (i, j)),
            scratch_shapes=[pltpu.VMEM((tm, tn), jnp.float32)],
        ),
        compiler_params=pltpu.CompilerParams(
            dimension_semantics=("parallel", "parallel", "arbitrary"),
            vmem_limit_bytes=vmem_limit,
        ),
        cost_estimate=pl.CostEstimate(flops=int(flops), transcendentals=0,
                                      bytes_accessed=int(bytes_accessed)),
    )(*operands)
    return yp[:M, :N]


# ----------------------- tiled matmul (make_weight only) --------------------

def _matmul_kernel(a_ref, b_ref, o_ref, acc_ref):
    @pl.when(pl.program_id(2) == 0)
    def _():
        acc_ref[...] = jnp.zeros_like(acc_ref)
    acc_ref[...] += jnp.dot(a_ref[...], b_ref[...],
                            preferred_element_type=jnp.float32)

    @pl.when(pl.program_id(2) == pl.num_programs(2) - 1)
    def _():
        o_ref[...] = acc_ref[...].astype(o_ref.dtype)


def pallas_matmul(a, b, *, tiles=None, vmem_limit=None):
    """(M, K) @ (K, N) -> (M, N), tiled, f32 accumulation, output a.dtype."""
    if tiles is None or vmem_limit is None:
        dt, dv = _chip_defaults()
        tiles = tiles or dt
        vmem_limit = vmem_limit or dv
    M, K = a.shape
    _, N = b.shape
    tm, tn, tk, Mp, Np, Kp = _tile_dims(M, N, K, a.dtype.itemsize, tiles)
    yp = pl.pallas_call(
        _matmul_kernel,
        out_shape=jax.ShapeDtypeStruct((Mp, Np), a.dtype),
        grid_spec=pltpu.PrefetchScalarGridSpec(
            num_scalar_prefetch=0,
            grid=(Mp // tm, Np // tn, Kp // tk),
            in_specs=[pl.BlockSpec((tm, tk), lambda i, j, k: (i, k)),
                      pl.BlockSpec((tk, tn), lambda i, j, k: (k, j))],
            out_specs=pl.BlockSpec((tm, tn), lambda i, j, k: (i, j)),
            scratch_shapes=[pltpu.VMEM((tm, tn), jnp.float32)],
        ),
        compiler_params=pltpu.CompilerParams(
            dimension_semantics=("parallel", "parallel", "arbitrary"),
            vmem_limit_bytes=vmem_limit,
        ),
    )(_pad2d(a, Mp, Kp), _pad2d(b.astype(a.dtype), Kp, Np))
    return yp[:M, :N]


# -------------------------------- im2col ------------------------------------

def _im2col_nhwc(x, kh, kw, stride, padding, dilation):
    """NHWC patches: (N, OH, OW, Cin*KH*KW) — no host-side transpose needed.

    Feature order along the last dim is (C, KH, KW) with C slowest, matching
    w.reshape(Cout, Cin*KH*KW) / a.reshape(r, -1) of PyTorch OIHW weights.
    """
    patches = lax.conv_general_dilated_patches(
        x,
        filter_shape=(kh, kw),
        window_strides=tuple(stride),
        padding=[(padding[0], padding[0]), (padding[1], padding[1])],
        rhs_dilation=tuple(dilation),
        dimension_numbers=("NCHW", "OIHW", "NHWC"),
    )
    n, oh, ow, feat = patches.shape
    return patches.reshape(n * oh * ow, feat), (n, oh, ow)


# ---------------------------- PeftBase equivalent ----------------------------

class PeftBasePallas:
    """JAX/Pallas analogue of PeftBase for Linear and Conv2d layers.

    forward(x, A, B) == orig_forward(x) + op(x, make_weight(A, B)), computed
    with the exact reassociation op(x, B@A) == (x @ A^T) @ B^T fused into one
    Pallas GEMM.  The frozen weight/bias are reshaped, cast and zero-padded to
    tile multiples once here (not per forward call).
    """

    def __init__(self, prefix, kind, orig_weight, orig_bias=None,
                 stride=(1, 1), padding=(0, 0), dilation=(1, 1), groups=1,
                 compute_dtype=None):
        self.prefix = prefix + "."
        self.kind = kind
        self.shape = orig_weight.shape
        self.layer_kwargs = {}
        self._tiles, self._vmem_limit = _chip_defaults()
        dtype = compute_dtype or orig_weight.dtype

        if kind == "linear":
            n_out, k_in = orig_weight.shape
            w2d = orig_weight
        elif kind == "conv2d":
            if groups != 1:
                # TODO(synk): grouped / depthwise conv (groups > 1) unsupported.
                raise NotImplementedError("groups > 1 is not supported.")
            n_out = int(orig_weight.shape[0])
            k_in = int(orig_weight.shape[1] * orig_weight.shape[2] * orig_weight.shape[3])
            w2d = orig_weight.reshape(n_out, k_in)
            self.layer_kwargs = dict(stride=_pair(stride), padding=_pair(padding),
                                     dilation=_pair(dilation), groups=groups)
        else:
            raise NotImplementedError("Only Linear and Conv2d are supported layers.")

        self.n_out, self.k_in = int(n_out), int(k_in)
        _, _, _, _, Np, Kp = _tile_dims(8, self.n_out, self.k_in,
                                        jnp.dtype(dtype).itemsize, self._tiles)
        # Pre-cast + pre-pad the frozen weight / bias once (saves an HBM round
        # trip and an XLA pad/convert per forward call).
        self._w_pad = _pad2d(w2d.astype(dtype), Np, Kp)
        self._bias_pad = None if orig_bias is None else _pad2d(
            orig_bias.astype(jnp.float32).reshape(1, self.n_out), 1, Np)

    # -- core fused path ------------------------------------------------------
    def _apply(self, x, A=None, B=None):
        a2 = None if A is None else A.reshape(A.shape[0], -1)     # (r, K)
        b2 = None if B is None else B.reshape(B.shape[0], -1)     # (N, r)
        if self.kind == "linear":
            lead = x.shape[:-1]
            y = lora_linear_2d(x.reshape(-1, self.k_in), self._w_pad, a2, b2,
                               self._bias_pad, n_out=self.n_out,
                               tiles=self._tiles, vmem_limit=self._vmem_limit)
            return y.reshape(*lead, self.n_out)
        # conv2d: one im2col GEMM (NHWC patches, no im2col transpose); output
        # transposed back to NCHW only at the end to match F.conv2d semantics.
        kh, kw = self.shape[2], self.shape[3]
        lk = self.layer_kwargs
        pm, (n, oh, ow) = _im2col_nhwc(x, kh, kw, lk["stride"], lk["padding"],
                                       lk["dilation"])
        y = lora_linear_2d(pm, self._w_pad, a2, b2, self._bias_pad,
                           n_out=self.n_out, tiles=self._tiles,
                           vmem_limit=self._vmem_limit)
        return y.reshape(n, oh, ow, self.n_out).transpose(0, 3, 1, 2)

    # -- PeftBase API ----------------------------------------------------------
    def make_weight(self, A, B):
        """W = B.view(B0,-1) @ A.view(A0,-1) reshaped to the orig weight shape.
        Kept for API parity; the fused forward path never materializes it."""
        A2 = A.reshape(A.shape[0], -1)
        B2 = B.reshape(B.shape[0], -1)
        return pallas_matmul(B2, A2, tiles=self._tiles,
                             vmem_limit=self._vmem_limit).reshape(self.shape)

    def orig_forward(self, x):
        return self._apply(x)

    def forward(self, x, A, B):
        """orig_forward(x) + op(x, make_weight(A, B)) — fused, one pass over x."""
        return self._apply(x, A, B)


# ----------------------------------- main ------------------------------------

if __name__ == "__main__":
    key = jax.random.PRNGKey(0)
    ks = jax.random.split(key, 10)

    def irand(k, shape, lo=-2, hi=3):
        # Integer-valued f32 inputs keep every matmul bit-exact on the MXU
        # regardless of precision mode, so the asserts check structure exactly.
        return jax.random.randint(k, shape, lo, hi).astype(jnp.float32)

    # ----- Linear case: in=32, out=48, rank=4, x (2, 8, 32) -----
    in_f, out_f, rank = 32, 48, 4
    x_lin = irand(ks[0], (2, 8, in_f))
    w_lin = irand(ks[1], (out_f, in_f))
    b_lin = irand(ks[2], (out_f,))
    A_lin = irand(ks[3], (rank, in_f))       # lora_down
    B_lin = irand(ks[4], (out_f, rank))      # lora_up

    peft_lin = PeftBasePallas("lora_te.text_model.q_proj", "linear", w_lin, b_lin)
    y_lin = peft_lin.forward(x_lin, A_lin, B_lin)
    w_lora_lin = peft_lin.make_weight(A_lin, B_lin)

    w_tot = w_lin + B_lin @ A_lin
    y_lin_ref = x_lin @ w_tot.T + b_lin

    # ----- Conv2d case: x (2,4,16,16), Cin=4, Cout=8, k=3, pad=1, rank=4 -----
    Cin, Cout, KH, KW = 4, 8, 3, 3
    x_cnv = irand(ks[5], (2, Cin, 16, 16))
    w_cnv = irand(ks[6], (Cout, Cin, KH, KW))
    b_cnv = irand(ks[7], (Cout,))
    A_cnv = irand(ks[8], (rank, Cin, KH, KW))   # down conv weight
    B_cnv = irand(ks[9], (Cout, rank, 1, 1))    # up 1x1 conv weight

    peft_cnv = PeftBasePallas("lora_unet.conv1", "conv2d", w_cnv, b_cnv,
                              stride=(1, 1), padding=(1, 1), dilation=(1, 1),
                              groups=1)
    y_cnv = peft_cnv.forward(x_cnv, A_cnv, B_cnv)

    w_lora_cnv = (B_cnv.reshape(Cout, rank) @ A_cnv.reshape(rank, -1)).reshape(
        Cout, Cin, KH, KW)
    w_tot_cnv = w_cnv + w_lora_cnv
    y_cnv_ref = lax.conv_general_dilated(
        x_cnv, w_tot_cnv, window_strides=(1, 1), padding=[(1, 1), (1, 1)],
        dimension_numbers=("NCHW", "OIHW", "NCHW")) + b_cnv.reshape(1, Cout, 1, 1)

    jax.block_until_ready((y_lin, y_cnv, w_lora_lin))

    assert y_lin.shape == (2, 8, out_f)
    assert y_cnv.shape == (2, Cout, 16, 16)
    assert jnp.allclose(w_lora_lin, B_lin @ A_lin, atol=1e-6)
    assert jnp.allclose(y_lin, y_lin_ref, atol=1e-5, rtol=1e-5)
    assert jnp.allclose(y_cnv, y_cnv_ref, atol=1e-5, rtol=1e-5)

    print("KERNEL_OK")
</pallas_src>

<mosaic_0001>
module attributes {stable_mosaic.version = 11 : i64} {
  func.func @_xa_kernel(%arg0: i32, %arg1: i32, %arg2: memref<16x128xf32, #tpu.memory_space<vmem>>, %arg3: memref<128x128xf32, #tpu.memory_space<vmem>>, %arg4: memref<16x128xf32, #tpu.memory_space<vmem>>, %arg5: memref<16x128xf32, #tpu.memory_space<vmem>>) attributes {dimension_semantics = [#tpu.dimension_semantics<parallel>, #tpu.dimension_semantics<arbitrary>], iteration_bounds = array<i64: 1, 1>, scalar_prefetch = 0 : i64, scratch_operands = 1 : i64, tpu.core_type = #tpu.core_type<tc>, window_params = [{transform_indices = @transform_0, window_bounds = array<i64: 16, 128>}, {pipeline_mode = #tpu.pipeline_mode<synchronous>, transform_indices = @transform_1, window_bounds = array<i64: 128, 128>}, {transform_indices = @transform_2, window_bounds = array<i64: 16, 128>}]} {
    %c0_i32 = arith.constant 0 : i32
    %0 = arith.cmpi eq, %arg1, %c0_i32 : i32
    %1 = arith.extui %0 : i1 to i32
    %c0_i32_0 = arith.constant 0 : i32
    %2 = arith.cmpi ne, %1, %c0_i32_0 : i32
    scf.if %2 {
      %cst_9 = arith.constant 0.000000e+00 : f32
      %15 = vector.broadcast %cst_9 : f32 to vector<16x128xf32>
      %c0_10 = arith.constant 0 : index
      %c0_11 = arith.constant 0 : index
      %16 = vector.load %arg5[%c0_10, %c0_11] : memref<16x128xf32, #tpu.memory_space<vmem>>, vector<16x128xf32>
      tpu.vector_store %arg5[%c0_10, %c0_11], %15 {strides = array<i32>} : memref<16x128xf32, #tpu.memory_space<vmem>>, vector<16x128xf32>,
    } else {
    }
    %c128_i32 = arith.constant 128 : i32
    %3 = arith.muli %arg1, %c128_i32 : i32
    %4 = tpu.assume_multiple %3, 128 : i32
    %c0 = arith.constant 0 : index
    %c0_1 = arith.constant 0 : index
    %5 = vector.load %arg5[%c0, %c0_1] : memref<16x128xf32, #tpu.memory_space<vmem>>, vector<16x128xf32>
    %c0_2 = arith.constant 0 : index
    %c0_3 = arith.constant 0 : index
    %6 = vector.load %arg2[%c0_2, %c0_3] : memref<16x128xf32, #tpu.memory_space<vmem>>, vector<16x128xf32>
    %7 = arith.index_cast %4 : i32 to index
    %c0_4 = arith.constant 0 : index
    %8 = vector.load %arg3[%7, %c0_4] : memref<128x128xf32, #tpu.memory_space<vmem>>, vector<128x128xf32>
    %cst = arith.constant dense<0.000000e+00> : vector<16x128xf32>
    %9 = tpu.matmul %6, %8, %cst {dimension_numbers = #tpu.dot_dimension_numbers<[1], [0], [0], [1], [0, 0, 1, 1], [], []>} : vector<16x128xf32>, vector<128x128xf32>, vector<16x128xf32> -> vector<16x128xf32>
    %10 = arith.addf %5, %9 : vector<16x128xf32>
    %c0_5 = arith.constant 0 : index
    %c0_6 = arith.constant 0 : index
    %11 = vector.load %arg5[%c0_5, %c0_6] : memref<16x128xf32, #tpu.memory_space<vmem>>, vector<16x128xf32>
    tpu.vector_store %arg5[%c0_5, %c0_6], %10 {strides = array<i32>} : memref<16x128xf32, #tpu.memory_space<vmem>>, vector<16x128xf32>,
    %c0_i32_7 = arith.constant 0 : i32
    %12 = arith.cmpi eq, %arg1, %c0_i32_7 : i32
    %13 = arith.extui %12 : i1 to i32
    %c0_i32_8 = arith.constant 0 : i32
    %14 = arith.cmpi ne, %13, %c0_i32_8 : i32
    scf.if %14 {
      %c0_9 = arith.constant 0 : index
      %c0_10 = arith.constant 0 : index
      %15 = vector.load %arg5[%c0_9, %c0_10] : memref<16x128xf32, #tpu.memory_space<vmem>>, vector<16x128xf32>
      %c0_11 = arith.constant 0 : index
      %c0_12 = arith.constant 0 : index
      %16 = vector.load %arg4[%c0_11, %c0_12] : memref<16x128xf32, #tpu.memory_space<vmem>>, vector<16x128xf32>
      tpu.vector_store %arg4[%c0_11, %c0_12], %15 {strides = array<i32>} : memref<16x128xf32, #tpu.memory_space<vmem>>, vector<16x128xf32>,
    } else {
    }
    return
  }
  func.func @transform_0(%arg0: i32, %arg1: i32) -> (i32, i32) {
    %c0_i32 = arith.constant 0 : i32
    return %arg0, %arg1 : i32, i32
  }
  func.func @transform_1(%arg0: i32, %arg1: i32) -> (i32, i32) {
    %c0_i32 = arith.constant 0 : i32
    %c0_i32_0 = arith.constant 0 : i32
    %c0_i32_1 = arith.constant 0 : i32
    return %c0_i32, %c0_i32_0 : i32, i32
  }
  func.func @transform_2(%arg0: i32, %arg1: i32) -> (i32, i32) {
    %c0_i32 = arith.constant 0 : i32
    %c0_i32_0 = arith.constant 0 : i32
    return %arg0, %c0_i32 : i32, i32
  }
}

</mosaic_0001>

<bundles_post_ra>
// kernel: tpu_custom_call.1
= control target key start
LH: loop header
LB: loop body
LE: loop exit
PB: predicated region body
PF: predicated region fallthrough
CT: control target
= control target key end

     0   :  { %7 = vsyncpa [#allocation4], 0  ;;  %s334_s0 = inlined_call_operand.hbm [shape: f32[16,128], index: 0, kind: input, shape index: {}]   ;;  %s335_s1 = inlined_call_operand.hbm [shape: f32[128,128], index: 1, kind: input, shape index: {}]   ;;  %s336_s2 = inlined_call_operand.hbm [shape: f32[16,128], index: 2, kind: output, shape index: {}]  }
   0x1   :  { %8 = vsyncpa [#allocation7], 0 }
   0x2   :  { %9 = vsyncpa [#allocation5], 0  ;;  %s296_s9 = smov [#allocation3]  }
   0x3   :  { %s15_s10 = sshll.u32 %s296_s9, 4  ;;  %s16_s10 = int_to_ptr.vmem [resolvable:$true] %s15_s10 }
   0x4   :  { %s238_s11 = scalar_lea.vmem %s16_s10, 256  ;;  %p243_p1 = scmp.lt.s32.totalorder %s16_s10, %s16_s10 }
   0x5   :  { %p239_p0 = scmp.ne.s32.totalorder %s16_s10, %s238_s11  ;;  %p244_p2 = scmp.lt.s32.totalorder %s238_s11, %s238_s11 }
   0x7   :  { %p245_p3 = por %p244_p2, %p243_p1 }
   0x9   :  { %p246_p4 = pnand %p245_p3, %p239_p0 }
   0xb   :  { %249 = shalt.err (!%p246_p4)
}
   0xc   :  { %s297_s12 = smov 128   ;;  %s298_s13 = smov 8  }
   0xd   :  { %21 = dma.hbm_to_vmem [thread:$0]  %s334_s0, 256, %s16_s10, [#allocation4], %s297_s12, %s297_s12, %s298_s13  }
   0xe   :  { %s299_s16 = smov [#allocation6]  }
   0xf   :  { %s27_s17 = sshll.u32 %s299_s16, 4  ;;  %s28_s17 = int_to_ptr.vmem [resolvable:$true] %s27_s17 }
  0x10   :  { %s258_s18 = scalar_lea.vmem %s28_s17, 2048  ;;  %p263_p6 = scmp.lt.s32.totalorder %s28_s17, %s28_s17 }
  0x11   :  { %p259_p5 = scmp.ne.s32.totalorder %s28_s17, %s258_s18  ;;  %p264_p7 = scmp.lt.s32.totalorder %s258_s18, %s258_s18 }
  0x13   :  { %p265_p8 = por %p264_p7, %p263_p6 }
  0x15   :  { %p266_p9 = pnand %p265_p8, %p259_p5 }
  0x17   :  { %269 = shalt.err (!%p266_p9)
}
  0x18   :  { %33 = dma.hbm_to_vmem [thread:$0]  %s335_s1, 2048, %s28_s17, [#allocation7], %s297_s12, %s297_s12, %s298_s13  }
  0x19   :  { %290 = dma.done.wait [#allocation4], 256  }
  0x1a   :  { %291 = vsyncadd [#allocation4], 4294967040 }
  0x1b   :  { %292 = dma.done.wait [#allocation7], 2048  }
  0x1c   :  { %293 = vsyncadd [#allocation7], 4294965248  ;;  %v67_v0 = vld [vmem:[#allocation6 + $0x78] sm:$0xff]  ;;  %v66_v1 = vld [vmem:[#allocation6 + $0x70] sm:$0xff]  ;;  %s300_s0 = smov [#allocation8]  }
  0x1d   :  { %190 = vmatprep.subr.mxu0 %v67_v0  ;;  %v65_v2 = vld [vmem:[#allocation6 + $0x68] sm:$0xff]  ;;  %v64_v3 = vld [vmem:[#allocation6 + $0x60] sm:$0xff]  ;;  %v49_v4 = vld [vmem:[#allocation3] sm:$0xff]  ;;  %s159_s1 = sshll.u32 %s300_s0, 4  ;;  %s160_s1 = int_to_ptr.vmem [resolvable:$true] %s159_s1 }
  0x1e   :  { %191 = vmatpush3.msra.mxu0 %v67_v0  ;;  %v63_v5 = vld [vmem:[#allocation6 + $0x58] sm:$0xff]  ;;  %222 = vmatprep.mubr.f32.mxu0 %v49_v4  ;;  %v62_v6 = vld [vmem:[#allocation6 + $0x50] sm:$0xff]  ;;  %v61_v7 = vld [vmem:[#allocation6 + $0x48] sm:$0xff]  ;;  %s270_s21 = scalar_lea.vmem %s160_s1, 256  ;;  %p275_p11 = scmp.lt.s32.totalorder %s160_s1, %s160_s1 }
  0x1f   :  { %192 = vmatprep.subr.mxu0 %v66_v1  ;;  %v60_v8 = vld [vmem:[#allocation6 + $0x40] sm:$0xff]  ;;  %v59_v9 = vld [vmem:[#allocation6 + $0x38] sm:$0xff]  ;;  %v58_v10 = vld [vmem:[#allocation6 + $0x30] sm:$0xff]  ;;  %p271_p10 = scmp.ne.s32.totalorder %s160_s1, %s270_s21  ;;  %p276_p12 = scmp.lt.s32.totalorder %s270_s21, %s270_s21 }
  0x20   :  { %193 = vmatpush3.msra.mxu0 %v66_v1  ;;  %v57_v11 = vld [vmem:[#allocation6 + $0x28] sm:$0xff]  ;;  %v56_v12 = vld [vmem:[#allocation6 + $0x20] sm:$0xff]  ;;  %v55_v13 = vld [vmem:[#allocation6 + $0x18] sm:$0xff] }
  0x21   :  { %194 = vmatprep.subr.mxu0 %v65_v2  ;;  %v54_v14 = vld [vmem:[#allocation6 + $0x10] sm:$0xff]  ;;  %v53_v15 = vld [vmem:[#allocation6 + $0x8] sm:$0xff]  ;;  %v52_v16 = vld [vmem:[#allocation6] sm:$0xff]  ;;  %p277_p13 = por %p276_p12, %p275_p11 }
  0x22   :  { %195 = vmatpush3.msra.mxu0 %v65_v2  ;;  %v50_v17 = vld [vmem:[#allocation3 + $0x8] sm:$0xff] }
  0x23   :  { %196 = vmatprep.subr.mxu0 %v64_v3  ;;  %p278_p0 = pnand %p277_p13, %p271_p10 }
  0x24   :  { %197 = vmatpush3.msra.mxu0 %v64_v3 }
  0x25   :  { %198 = vmatprep.subr.mxu0 %v63_v5 }
  0x26   :  { %199 = vmatpush3.msra.mxu0 %v63_v5 }
  0x27   :  { %200 = vmatprep.subr.mxu0 %v62_v6 }
  0x28   :  { %201 = vmatpush3.msra.mxu0 %v62_v6 }
  0x29   :  { %202 = vmatprep.subr.mxu0 %v61_v7 }
  0x2a   :  { %203 = vmatpush3.msra.mxu0 %v61_v7 }
  0x2b   :  { %204 = vmatprep.subr.mxu0 %v60_v8 }
  0x2c   :  { %205 = vmatpush3.msra.mxu0 %v60_v8 }
  0x2d   :  { %206 = vmatprep.subr.mxu0 %v59_v9 }
  0x2e   :  { %207 = vmatpush3.msra.mxu0 %v59_v9 }
  0x2f   :  { %208 = vmatprep.subr.mxu0 %v58_v10 }
  0x30   :  { %209 = vmatpush3.msra.mxu0 %v58_v10 }
  0x31   :  { %210 = vmatprep.subr.mxu0 %v57_v11 }
  0x32   :  { %211 = vmatpush3.msra.mxu0 %v57_v11 }
  0x33   :  { %212 = vmatprep.subr.mxu0 %v56_v12 }
  0x34   :  { %213 = vmatpush3.msra.mxu0 %v56_v12 }
  0x35   :  { %214 = vmatprep.subr.mxu0 %v55_v13 }
  0x36   :  { %215 = vmatpush3.msra.mxu0 %v55_v13 }
  0x37   :  { %216 = vmatprep.subr.mxu0 %v54_v14 }
  0x38   :  { %217 = vmatpush3.msra.mxu0 %v54_v14 }
  0x39   :  { %218 = vmatprep.subr.mxu0 %v53_v15 }
  0x3a   :  { %219 = vmatpush3.msra.mxu0 %v53_v15 }
  0x3b   :  { %220 = vmatprep.subr.mxu0 %v52_v16 }
  0x3c   :  { %221 = vmatpush3.msra.mxu0 %v52_v16 }
  0x3d   :  { %223 = vmatmul.mubr.f32.vlgmr.msra.gmra.mxu0 %v50_v17 }
  0xfd   :  { %v224_v18 = vpop.f32.mrf.mxu0 }
  0xfe   :  { %153 = vst [vmem:[#allocation8 + $0x8] sm:$0xff] %v224_v18 }
  0xff   :  { %v134_v19 = vpop.f32.mrf.mxu0 }
 0x100   :  { %152 = vst [vmem:[#allocation8] sm:$0xff] %v134_v19 }
 0x101   :  { %281 = shalt.err (!%p278_p0)
}
 0x102   :  { %165 = dma.vmem_to_hbm [thread:$0]  %s160_s1, 256, %s336_s2, [#allocation5], %s297_s12, %s297_s12, %s298_s13  }
 0x103   :  { %294 = dma.done.wait [#allocation5], 256  }
 0x104   :  { %295 = vsyncadd [#allocation5], 4294967040 }
 0x105   :  { %169 = vsyncpa [#allocation4], 1 }
 0x106   :  { %170 = vsyncpa [#allocation7], 1 }
 0x107   :  { %171 = vsyncpa [#allocation5], 1 }

</bundles_post_ra>
